<compile_context>
chip_gen: v5e
topology: v5e:2x2
jax: 0.10.0
libtpu: 0.0.40
codegen_flags: <defaults>
</compile_context>

<pallas_src>
import jax
import jax.numpy as jnp
from jax.experimental import pallas as pl
from jax.experimental.pallas import tpu as pltpu


def _triplet_mlp_kernel(x1_ref, x2_ref, x3_ref, w1_ref, b1_ref, w2_ref, b2_ref,
                        o1_ref, o2_ref, o3_ref):
    # x*_ref : (tm, D_in)   bf16   -- one row tile per branch
    # w1_ref : (D_in, HIDDEN) bf16    b1_ref: (1, HIDDEN) f32
    # w2_ref : (HIDDEN, EMB)  bf16    b2_ref: (1, EMB)    f32
    # o*_ref : (tm, EMB)    f32    -- lane-dense output tiles (EMB % 128 == 0)
    w1 = w1_ref[...]
    b1 = b1_ref[...]
    w2 = w2_ref[...]
    b2 = b2_ref[...]

    def embed(x_ref, o_ref):
        # bf16 MXU inputs, f32 accumulation; bias/ReLU on the f32 VPU path.
        h = jnp.dot(x_ref[...], w1, preferred_element_type=jnp.float32) + b1
        h = jnp.maximum(h, 0.0)
        e = jnp.dot(h.astype(w2.dtype), w2,
                    preferred_element_type=jnp.float32) + b2
        o_ref[...] = e.astype(o_ref.dtype)

    # Shared embedding net applied to the three triplet branches.
    embed(x1_ref, o1_ref)
    embed(x2_ref, o2_ref)
    embed(x3_ref, o3_ref)


def triplet_net(i1, i2, i3, params, *, tm=512):
    """Apply the shared embedding net to (i1, i2, i3); return (E1, E2, E3)."""
    w1, b1, w2, b2 = params
    B = i1.shape[0]
    d_in = w1.shape[0]
    hidden = w1.shape[1]
    emb = w2.shape[1]

    # Flatten NCHW -> (B, D_in) and present the activations as bf16 (the MXU
    # input dtype) so the kernel reads half the activation bytes from HBM.
    # In a real pipeline the upstream producer should emit bf16 directly.
    x1 = i1.reshape(B, -1).astype(jnp.bfloat16)
    x2 = i2.reshape(B, -1).astype(jnp.bfloat16)
    x3 = i3.reshape(B, -1).astype(jnp.bfloat16)

    tm = min(tm, B)                      # toy batches: single full-extent tile
    grid = (pl.cdiv(B, tm),)

    x_spec = pl.BlockSpec((tm, d_in), lambda i: (i, 0))
    o_spec = pl.BlockSpec((tm, emb), lambda i: (i, 0))
    # Constant index maps => weights/biases DMA'd once, resident across grid.
    w1_spec = pl.BlockSpec((d_in, hidden), lambda i: (0, 0))
    b1_spec = pl.BlockSpec((1, hidden), lambda i: (0, 0))
    w2_spec = pl.BlockSpec((hidden, emb), lambda i: (0, 0))
    b2_spec = pl.BlockSpec((1, emb), lambda i: (0, 0))

    out_shape = jax.ShapeDtypeStruct((B, emb), jnp.float32)

    e1, e2, e3 = pl.pallas_call(
        _triplet_mlp_kernel,
        out_shape=(out_shape, out_shape, out_shape),
        grid_spec=pltpu.PrefetchScalarGridSpec(
            num_scalar_prefetch=0,
            grid=grid,
            in_specs=[x_spec, x_spec, x_spec,
                      w1_spec, b1_spec, w2_spec, b2_spec],
            out_specs=(o_spec, o_spec, o_spec),
        ),
        compiler_params=pltpu.CompilerParams(
            # Row axis is independent -> shard across v7x's 2 TensorCores.
            dimension_semantics=("parallel",),
            # Room for double-buffered (tm, D_in) tiles; < v7x 64 MiB physical.
            vmem_limit_bytes=48 * 1024 * 1024,
        ),
    )(x1, x2, x3, w1, b1, w2, b2)

    return e1, e2, e3


def init_params(key, d_in, hidden, emb):
    """Deterministic synthetic parameters: bf16 weights, f32 biases."""
    k1, k2, k3, k4 = jax.random.split(key, 4)
    w1 = (jax.random.normal(k1, (d_in, hidden), jnp.float32)
          * (1.0 / jnp.sqrt(d_in))).astype(jnp.bfloat16)
    b1 = jax.random.normal(k2, (1, hidden), jnp.float32) * 0.01
    w2 = (jax.random.normal(k3, (hidden, emb), jnp.float32)
          * (1.0 / jnp.sqrt(hidden))).astype(jnp.bfloat16)
    b2 = jax.random.normal(k4, (1, emb), jnp.float32) * 0.01
    return w1, b1, w2, b2


if __name__ == "__main__":
    # Small shapes consistent with an image-triplet forward pass.  At this
    # size the call is fixed-overhead / DMA-latency bound (B=2 < one sublane
    # tile -> masked output stores); the structural wins above matter at
    # realistic batch sizes.
    B, C, H, W = 2, 4, 16, 16
    D_IN = C * H * W           # 1024
    HIDDEN = 128               # MXU-native tile on v5e; use 256 on v6e/v7x
    EMB = 128                  # keeps hidden/output stores lane-dense

    key = jax.random.PRNGKey(0)
    kp, k1, k2, k3 = jax.random.split(key, 4)

    params = init_params(kp, D_IN, HIDDEN, EMB)
    i1 = jax.random.normal(k1, (B, C, H, W), jnp.float32)
    i2 = jax.random.normal(k2, (B, C, H, W), jnp.float32)
    i3 = jax.random.normal(k3, (B, C, H, W), jnp.float32)

    E1, E2, E3 = jax.jit(triplet_net)(i1, i2, i3, params)
    jax.block_until_ready((E1, E2, E3))

    # Pure-JAX reference of the embedding-net semantics (same bf16 weights,
    # bf16 MXU inputs, f32 accumulation).
    def ref_embed(x):
        w1, b1, w2, b2 = params
        xb = x.reshape(x.shape[0], -1).astype(jnp.bfloat16)
        h = jnp.dot(xb, w1, preferred_element_type=jnp.float32) + b1
        h = jnp.maximum(h, 0.0)
        return jnp.dot(h.astype(jnp.bfloat16), w2,
                       preferred_element_type=jnp.float32) + b2

    for got, inp in ((E1, i1), (E2, i2), (E3, i3)):
        ref = ref_embed(inp)
        assert got.shape == (B, EMB)
        assert jnp.allclose(got, ref, atol=2e-2, rtol=2e-2), (
            float(jnp.max(jnp.abs(got - ref))))

    print("KERNEL_OK")
</pallas_src>

<mosaic_0001>
module attributes {stable_mosaic.version = 11 : i64} {
  func.func @_triplet_mlp_kernel(%arg0: i32, %arg1: memref<2x1024xbf16, #tpu.memory_space<vmem>>, %arg2: memref<2x1024xbf16, #tpu.memory_space<vmem>>, %arg3: memref<2x1024xbf16, #tpu.memory_space<vmem>>, %arg4: memref<1024x128xbf16, #tpu.memory_space<vmem>>, %arg5: memref<1x128xf32, #tpu.memory_space<vmem>>, %arg6: memref<128x128xbf16, #tpu.memory_space<vmem>>, %arg7: memref<1x128xf32, #tpu.memory_space<vmem>>, %arg8: memref<2x128xf32, #tpu.memory_space<vmem>>, %arg9: memref<2x128xf32, #tpu.memory_space<vmem>>, %arg10: memref<2x128xf32, #tpu.memory_space<vmem>>) attributes {dimension_semantics = [#tpu.dimension_semantics<parallel>], iteration_bounds = array<i64: 1>, scalar_prefetch = 0 : i64, scratch_operands = 0 : i64, tpu.core_type = #tpu.core_type<tc>, window_params = [{transform_indices = @transform_0, window_bounds = array<i64: 2, 1024>}, {transform_indices = @transform_1, window_bounds = array<i64: 2, 1024>}, {transform_indices = @transform_2, window_bounds = array<i64: 2, 1024>}, {pipeline_mode = #tpu.pipeline_mode<synchronous>, transform_indices = @transform_3, window_bounds = array<i64: 1024, 128>}, {pipeline_mode = #tpu.pipeline_mode<synchronous>, transform_indices = @transform_4, window_bounds = array<i64: 1, 128>}, {pipeline_mode = #tpu.pipeline_mode<synchronous>, transform_indices = @transform_5, window_bounds = array<i64: 128, 128>}, {pipeline_mode = #tpu.pipeline_mode<synchronous>, transform_indices = @transform_6, window_bounds = array<i64: 1, 128>}, {transform_indices = @transform_7, window_bounds = array<i64: 2, 128>}, {transform_indices = @transform_8, window_bounds = array<i64: 2, 128>}, {transform_indices = @transform_9, window_bounds = array<i64: 2, 128>}]} {
    %c0 = arith.constant 0 : index
    %c0_0 = arith.constant 0 : index
    %0 = vector.load %arg4[%c0, %c0_0] : memref<1024x128xbf16, #tpu.memory_space<vmem>>, vector<1024x128xbf16>
    %c0_1 = arith.constant 0 : index
    %c0_2 = arith.constant 0 : index
    %1 = vector.load %arg5[%c0_1, %c0_2] : memref<1x128xf32, #tpu.memory_space<vmem>>, vector<1x128xf32>
    %c0_3 = arith.constant 0 : index
    %c0_4 = arith.constant 0 : index
    %2 = vector.load %arg6[%c0_3, %c0_4] : memref<128x128xbf16, #tpu.memory_space<vmem>>, vector<128x128xbf16>
    %c0_5 = arith.constant 0 : index
    %c0_6 = arith.constant 0 : index
    %3 = vector.load %arg7[%c0_5, %c0_6] : memref<1x128xf32, #tpu.memory_space<vmem>>, vector<1x128xf32>
    %c0_7 = arith.constant 0 : index
    %c0_8 = arith.constant 0 : index
    %4 = vector.load %arg1[%c0_7, %c0_8] : memref<2x1024xbf16, #tpu.memory_space<vmem>>, vector<2x1024xbf16>
    %cst = arith.constant dense<0.000000e+00> : vector<2x128xf32>
    %5 = tpu.matmul %4, %0, %cst {dimension_numbers = #tpu.dot_dimension_numbers<[1], [0], [0], [1], [0, 0, 1, 1], [], []>} : vector<2x1024xbf16>, vector<1024x128xbf16>, vector<2x128xf32> -> vector<2x128xf32>
    %6 = vector.broadcast %1 : vector<1x128xf32> to vector<2x128xf32>
    %7 = arith.addf %5, %6 : vector<2x128xf32>
    %cst_9 = arith.constant 0.000000e+00 : f32
    %8 = vector.broadcast %cst_9 : f32 to vector<2x128xf32>
    %9 = arith.maximumf %7, %8 : vector<2x128xf32>
    %10 = arith.truncf %9 : vector<2x128xf32> to vector<2x128xbf16>
    %cst_10 = arith.constant dense<0.000000e+00> : vector<2x128xf32>
    %11 = tpu.matmul %10, %2, %cst_10 {dimension_numbers = #tpu.dot_dimension_numbers<[1], [0], [0], [1], [0, 0, 1, 1], [], []>} : vector<2x128xbf16>, vector<128x128xbf16>, vector<2x128xf32> -> vector<2x128xf32>
    %12 = vector.broadcast %3 : vector<1x128xf32> to vector<2x128xf32>
    %13 = arith.addf %11, %12 : vector<2x128xf32>
    %c0_11 = arith.constant 0 : index
    %c0_12 = arith.constant 0 : index
    %14 = vector.load %arg8[%c0_11, %c0_12] : memref<2x128xf32, #tpu.memory_space<vmem>>, vector<2x128xf32>
    tpu.vector_store %arg8[%c0_11, %c0_12], %13 {strides = array<i32>} : memref<2x128xf32, #tpu.memory_space<vmem>>, vector<2x128xf32>,
    %c0_13 = arith.constant 0 : index
    %c0_14 = arith.constant 0 : index
    %15 = vector.load %arg2[%c0_13, %c0_14] : memref<2x1024xbf16, #tpu.memory_space<vmem>>, vector<2x1024xbf16>
    %cst_15 = arith.constant dense<0.000000e+00> : vector<2x128xf32>
    %16 = tpu.matmul %15, %0, %cst_15 {dimension_numbers = #tpu.dot_dimension_numbers<[1], [0], [0], [1], [0, 0, 1, 1], [], []>} : vector<2x1024xbf16>, vector<1024x128xbf16>, vector<2x128xf32> -> vector<2x128xf32>
    %17 = vector.broadcast %1 : vector<1x128xf32> to vector<2x128xf32>
    %18 = arith.addf %16, %17 : vector<2x128xf32>
    %cst_16 = arith.constant 0.000000e+00 : f32
    %19 = vector.broadcast %cst_16 : f32 to vector<2x128xf32>
    %20 = arith.maximumf %18, %19 : vector<2x128xf32>
    %21 = arith.truncf %20 : vector<2x128xf32> to vector<2x128xbf16>
    %cst_17 = arith.constant dense<0.000000e+00> : vector<2x128xf32>
    %22 = tpu.matmul %21, %2, %cst_17 {dimension_numbers = #tpu.dot_dimension_numbers<[1], [0], [0], [1], [0, 0, 1, 1], [], []>} : vector<2x128xbf16>, vector<128x128xbf16>, vector<2x128xf32> -> vector<2x128xf32>
    %23 = vector.broadcast %3 : vector<1x128xf32> to vector<2x128xf32>
    %24 = arith.addf %22, %23 : vector<2x128xf32>
    %c0_18 = arith.constant 0 : index
    %c0_19 = arith.constant 0 : index
    %25 = vector.load %arg9[%c0_18, %c0_19] : memref<2x128xf32, #tpu.memory_space<vmem>>, vector<2x128xf32>
    tpu.vector_store %arg9[%c0_18, %c0_19], %24 {strides = array<i32>} : memref<2x128xf32, #tpu.memory_space<vmem>>, vector<2x128xf32>,
    %c0_20 = arith.constant 0 : index
    %c0_21 = arith.constant 0 : index
    %26 = vector.load %arg3[%c0_20, %c0_21] : memref<2x1024xbf16, #tpu.memory_space<vmem>>, vector<2x1024xbf16>
    %cst_22 = arith.constant dense<0.000000e+00> : vector<2x128xf32>
    %27 = tpu.matmul %26, %0, %cst_22 {dimension_numbers = #tpu.dot_dimension_numbers<[1], [0], [0], [1], [0, 0, 1, 1], [], []>} : vector<2x1024xbf16>, vector<1024x128xbf16>, vector<2x128xf32> -> vector<2x128xf32>
    %28 = vector.broadcast %1 : vector<1x128xf32> to vector<2x128xf32>
    %29 = arith.addf %27, %28 : vector<2x128xf32>
    %cst_23 = arith.constant 0.000000e+00 : f32
    %30 = vector.broadcast %cst_23 : f32 to vector<2x128xf32>
    %31 = arith.maximumf %29, %30 : vector<2x128xf32>
    %32 = arith.truncf %31 : vector<2x128xf32> to vector<2x128xbf16>
    %cst_24 = arith.constant dense<0.000000e+00> : vector<2x128xf32>
    %33 = tpu.matmul %32, %2, %cst_24 {dimension_numbers = #tpu.dot_dimension_numbers<[1], [0], [0], [1], [0, 0, 1, 1], [], []>} : vector<2x128xbf16>, vector<128x128xbf16>, vector<2x128xf32> -> vector<2x128xf32>
    %34 = vector.broadcast %3 : vector<1x128xf32> to vector<2x128xf32>
    %35 = arith.addf %33, %34 : vector<2x128xf32>
    %c0_25 = arith.constant 0 : index
    %c0_26 = arith.constant 0 : index
    %36 = vector.load %arg10[%c0_25, %c0_26] : memref<2x128xf32, #tpu.memory_space<vmem>>, vector<2x128xf32>
    tpu.vector_store %arg10[%c0_25, %c0_26], %35 {strides = array<i32>} : memref<2x128xf32, #tpu.memory_space<vmem>>, vector<2x128xf32>,
    return
  }
  func.func @transform_0(%arg0: i32) -> (i32, i32) {
    %c0_i32 = arith.constant 0 : i32
    %c0_i32_0 = arith.constant 0 : i32
    return %arg0, %c0_i32 : i32, i32
  }
  func.func @transform_1(%arg0: i32) -> (i32, i32) {
    %c0_i32 = arith.constant 0 : i32
    %c0_i32_0 = arith.constant 0 : i32
    return %arg0, %c0_i32 : i32, i32
  }
  func.func @transform_2(%arg0: i32) -> (i32, i32) {
    %c0_i32 = arith.constant 0 : i32
    %c0_i32_0 = arith.constant 0 : i32
    return %arg0, %c0_i32 : i32, i32
  }
  func.func @transform_3(%arg0: i32) -> (i32, i32) {
    %c0_i32 = arith.constant 0 : i32
    %c0_i32_0 = arith.constant 0 : i32
    %c0_i32_1 = arith.constant 0 : i32
    return %c0_i32, %c0_i32_0 : i32, i32
  }
  func.func @transform_4(%arg0: i32) -> (i32, i32) {
    %c0_i32 = arith.constant 0 : i32
    %c0_i32_0 = arith.constant 0 : i32
    %c0_i32_1 = arith.constant 0 : i32
    return %c0_i32, %c0_i32_0 : i32, i32
  }
  func.func @transform_5(%arg0: i32) -> (i32, i32) {
    %c0_i32 = arith.constant 0 : i32
    %c0_i32_0 = arith.constant 0 : i32
    %c0_i32_1 = arith.constant 0 : i32
    return %c0_i32, %c0_i32_0 : i32, i32
  }
  func.func @transform_6(%arg0: i32) -> (i32, i32) {
    %c0_i32 = arith.constant 0 : i32
    %c0_i32_0 = arith.constant 0 : i32
    %c0_i32_1 = arith.constant 0 : i32
    return %c0_i32, %c0_i32_0 : i32, i32
  }
  func.func @transform_7(%arg0: i32) -> (i32, i32) {
    %c0_i32 = arith.constant 0 : i32
    %c0_i32_0 = arith.constant 0 : i32
    return %arg0, %c0_i32 : i32, i32
  }
  func.func @transform_8(%arg0: i32) -> (i32, i32) {
    %c0_i32 = arith.constant 0 : i32
    %c0_i32_0 = arith.constant 0 : i32
    return %arg0, %c0_i32 : i32, i32
  }
  func.func @transform_9(%arg0: i32) -> (i32, i32) {
    %c0_i32 = arith.constant 0 : i32
    %c0_i32_0 = arith.constant 0 : i32
    return %arg0, %c0_i32 : i32, i32
  }
}

</mosaic_0001>

<bundles_post_ra>
// kernel: triplet_net.1
= control target key start
LH: loop header
LB: loop body
LE: loop exit
PB: predicated region body
PF: predicated region fallthrough
CT: control target
= control target key end

     0   :  { %15 = vsyncpa [#allocation3], 0  ;;  %s2055_s0 = inlined_call_operand.vmem [shape: bf16[2,1024], index: 0, kind: input, shape index: {}]   ;;  %s2056_s1 = inlined_call_operand.vmem [shape: bf16[2,1024], index: 1, kind: input, shape index: {}]   ;;  %s2057_s2 = inlined_call_operand.vmem [shape: bf16[2,1024], index: 2, kind: input, shape index: {}]   ;;  %s2058_s3 = inlined_call_operand.hbm [shape: bf16[1024,128], index: 3, kind: input, shape index: {}]   ;;  %s2059_s4 = inlined_call_operand.vmem [shape: f32[1,128], index: 4, kind: input, shape index: {}]   ;;  %s2060_s5 = inlined_call_operand.vmem [shape: bf16[128,128], index: 5, kind: input, shape index: {}]   ;;  %s2061_s6 = inlined_call_operand.vmem [shape: f32[1,128], index: 6, kind: input, shape index: {}]   ;;  %s2062_s7 = inlined_call_operand.hbm [shape: f32[2,128], index: 7, kind: output, shape index: {0}]   ;;  %s2063_s8 = inlined_call_operand.hbm [shape: f32[2,128], index: 8, kind: output, shape index: {1}]   ;;  %s2064_s9 = inlined_call_operand.hbm [shape: f32[2,128], index: 9, kind: output, shape index: {2}]  }
   0x1   :  { %16 = vsyncpa [#allocation4], 0 }
   0x2   :  { %17 = vsyncpa [#allocation7], 0  ;;  %s28_s11 = sshll.u32 %s2058_s3, 4  ;;  %s1566_s12 = smov [#allocation2]   ;;  %s29_s11 = int_to_ptr.hbm [resolvable:$true] %s28_s11 }
   0x3   :  { %s30_s13 = sshll.u32 %s1566_s12, 4  ;;  %s1567_s14 = smov 64   ;;  %s31_s13 = int_to_ptr.vmem [resolvable:$true] %s30_s13 }
   0x4   :  { %s1568_s15 = smov 4  }
   0x5   :  { %36 = dma.hbm_to_vmem [thread:$0]  %s29_s11, 8192, %s31_s13, [#allocation3], %s1567_s14, %s1567_s14, %s1568_s15  }
   0x6   :  { %1560 = dma.done.wait [#allocation3], 8192  }
   0x7   :  { %1561 = vsyncadd [#allocation3], 4294959104  ;;  %v1625_v0 = vld [vmem:[#allocation2 + $0x38] sm:$0xff]  ;;  %v1635_v4 = vld [vmem:[#allocation2 + $0x30] sm:$0xff]  ;;  %s1066_s3 = sshll.u32 %s2063_s8, 4  ;;  %s1569_s16 = smov [#allocation6]   ;;  %s1067_s3 = int_to_ptr.hbm [resolvable:$true] %s1066_s3 }
   0x8   :  { %v1627_v1 = vld [vmem:[#allocation2 + $0x78] sm:$0xff]  ;;  %599 = vmatpush.bf16.msra.mxu0 %v1625_v0  ;;  %v1637_v5 = vld [vmem:[#allocation2 + $0x70] sm:$0xff]  ;;  %v1647_v8 = vld [vmem:[#allocation2 + $0x28] sm:$0xff]  ;;  %s1570_s17 = smov [#allocation5]   ;;  %s1055_s20 = sshll.u32 %s2062_s7, 4  ;;  %s1056_s20 = int_to_ptr.hbm [resolvable:$true] %s1055_s20 }
   0x9   :  { %v1629_v2 = vld [vmem:[#allocation2 + $0xb8] sm:$0xff]  ;;  %612 = vmatpush.bf16.msra.mxu1 %v1627_v1  ;;  %v1641_v6 = vld [vmem:[#allocation2 + $0xb0] sm:$0xff]  ;;  %v1649_v9 = vld [vmem:[#allocation2 + $0x68] sm:$0xff]  ;;  %s1571_s21 = smov [#allocation8]   ;;  %s1077_s8 = sshll.u32 %s2064_s9, 4  ;;  %s1078_s8 = int_to_ptr.hbm [resolvable:$true] %s1077_s8 }
   0xa   :  { %v1631_v3 = vld [vmem:[#allocation2 + $0xf8] sm:$0xff]  ;;  %625 = vmatpush.bf16.msra.mxu2 %v1629_v2  ;;  %v1643_v7 = vld [vmem:[#allocation2 + $0xf0] sm:$0xff]  ;;  %v1653_v10 = vld [vmem:[#allocation2 + $0xa8] sm:$0xff]  ;;  %s1075_s22 = sshll.u32 %s1571_s21, 4  ;;  %s1076_s22 = int_to_ptr.vmem [resolvable:$true] %s1075_s22 }
   0xb   :  { %638 = vmatpush.bf16.msra.mxu3 %v1631_v3  ;;  %v1655_v11 = vld [vmem:[#allocation2 + $0xe8] sm:$0xff]  ;;  %v1659_v12 = vld [vmem:[#allocation2 + $0x20] sm:$0xff]  ;;  %v193_v16 = vld [vmem:[%s2055_s0] sm:$0xff]  ;;  %s1064_s0 = sshll.u32 %s1569_s16, 4  ;;  %s1065_s0 = int_to_ptr.vmem [resolvable:$true] %s1064_s0 }
   0xc   :  { %600 = vmatpush.bf16.msra.mxu0 %v1635_v4  ;;  %v1661_v13 = vld [vmem:[#allocation2 + $0x60] sm:$0xff]  ;;  %v1674_v17 = vld [vmem:[#allocation2 + $0x18] sm:$0xff]  ;;  %198 = vst [vmem:[#allocation1] ss:$9 sm:$0xff] %v193_v16  ;;  %v1684_v21 = vld [vmem:[#allocation2 + $0x10] sm:$0xff] }
   0xd   :  { %613 = vmatpush.bf16.msra.mxu1 %v1637_v5  ;;  %v1665_v14 = vld [vmem:[#allocation2 + $0xa0] sm:$0xff]  ;;  %v1676_v18 = vld [vmem:[#allocation2 + $0x58] sm:$0xff]  ;;  %v1688_v22 = vld [vmem:[#allocation2 + $0x50] sm:$0xff] }
   0xe   :  { %626 = vmatpush.bf16.msra.mxu2 %v1641_v6  ;;  %2092 = vst [vmem:[#allocation12_spill] sm:$0xff] %v1665_v14  ;;  %v1667_v15 = vld [vmem:[#allocation2 + $0xe0] sm:$0xff]  ;;  %v1680_v19 = vld [vmem:[#allocation2 + $0x98] sm:$0xff]  ;;  %v1692_v23 = vld [vmem:[#allocation2 + $0x90] sm:$0xff] }
   0xf   :  { %639 = vmatpush.bf16.msra.mxu3 %v1643_v7  ;;  %2093 = vst [vmem:[#allocation13_spill] sm:$0xff] %v1680_v19  ;;  %v1682_v20 = vld [vmem:[#allocation2 + $0xd8] sm:$0xff]  ;;  %v1694_v24 = vld [vmem:[#allocation2 + $0xd0] sm:$0xff]  ;;  %v1698_v25 = vld [vmem:[#allocation2 + $0x8] sm:$0xff] }
  0x10   :  { %601 = vmatpush.bf16.msra.mxu0 %v1647_v8  ;;  %2094 = vst [vmem:[#allocation14_spill] sm:$0xff] %v1692_v23  ;;  %v1700_v26 = vld [vmem:[#allocation2 + $0x48] sm:$0xff]  ;;  %v1710_v29 = vld [vmem:[#allocation2] sm:$0xff]  ;;  %v1720_v33 = vld [vmem:[#allocation2 + $0x138] sm:$0xff] }
  0x11   :  { %614 = vmatpush.bf16.msra.mxu1 %v1649_v9  ;;  %v1704_v27 = vld [vmem:[#allocation2 + $0x88] sm:$0xff]  ;;  %v1712_v30 = vld [vmem:[#allocation2 + $0x40] sm:$0xff]  ;;  %v1722_v34 = vld [vmem:[#allocation2 + $0x178] sm:$0xff] }
  0x12   :  { %627 = vmatpush.bf16.msra.mxu2 %v1653_v10  ;;  %2095 = vst [vmem:[#allocation15_spill] sm:$0xff] %v1704_v27  ;;  %v1706_v28 = vld [vmem:[#allocation2 + $0xc8] sm:$0xff]  ;;  %v1716_v31 = vld [vmem:[#allocation2 + $0x80] sm:$0xff]  ;;  %v1724_v35 = vld [vmem:[#allocation2 + $0x1b8] sm:$0xff] }
  0x13   :  { %640 = vmatpush.bf16.msra.mxu3 %v1655_v11  ;;  %2096 = vst [vmem:[#allocation16_spill] sm:$0xff] %v1716_v31  ;;  %v1718_v32 = vld [vmem:[#allocation2 + $0xc0] sm:$0xff]  ;;  %v1726_v36 = vld [vmem:[#allocation2 + $0x1f8] sm:$0xff]  ;;  %v1730_v37 = vld [vmem:[#allocation2 + $0x130] sm:$0xff] }
  0x14   :  { %602 = vmatpush.bf16.msra.mxu0 %v1659_v12  ;;  %2097 = vst [vmem:[#allocation17_spill] sm:$0xff] %v1724_v35  ;;  %v1732_v38 = vld [vmem:[#allocation2 + $0x170] sm:$0xff]  ;;  %v199_v40 = vld [vmem:[#allocation1] sm:$0xff]  ;;  %v200_v42 = vld [vmem:[#allocation1 + $0x9] sm:$0xff] }
  0x15   :  { %615 = vmatpush.bf16.msra.mxu1 %v1661_v13  ;;  %v201_v39 = vld [vmem:[#allocation1 + $0x12] sm:$0xff]  ;;  %v202_v41 = vld [vmem:[#allocation1 + $0x1b] sm:$0xff]  ;;  %v1736_v43 = vld [vmem:[#allocation1 + $0x24] sm:$0xff] }
  0x16   :  { %628 = vmatpush.bf16.msra.mxu2 %v1665_v14  ;;  %v1738_v44 = vld [vmem:[#allocation1 + $0x2d] sm:$0xff]  ;;  %v1742_v45 = vld [vmem:[#allocation1 + $0x36] sm:$0xff]  ;;  %v1744_v46 = vld [vmem:[#allocation1 + $0x3f] sm:$0xff] }
  0x17   :  { %641 = vmatpush.bf16.msra.mxu3 %v1667_v15  ;;  %v770_v47 = vld [vmem:[%s2056_s1] sm:$0xff]  ;;  %v1751_v48 = vld [vmem:[#allocation2 + $0x1b0] sm:$0xff]  ;;  %v1757_v50 = vld [vmem:[#allocation2 + $0x128] sm:$0xff]  ;;  %s1053_s1 = sshll.u32 %s1570_s17, 4  ;;  %s1054_s1 = int_to_ptr.vmem [resolvable:$true] %s1053_s1 }
  0x18   :  { %603 = vmatpush.bf16.msra.mxu0 %v1674_v17  ;;  %2098 = vst [vmem:[#allocation18_spill] sm:$0xff] %v1751_v48  ;;  %v1753_v49 = vld [vmem:[#allocation2 + $0x1f0] sm:$0xff]  ;;  %v1759_v51 = vld [vmem:[#allocation2 + $0x168] sm:$0xff]  ;;  %v1769_v54 = vld [vmem:[#allocation2 + $0x120] sm:$0xff] }
  0x19   :  { %616 = vmatpush.bf16.msra.mxu1 %v1676_v18  ;;  %2099 = vst [vmem:[#allocation19_spill] sm:$0xff] %v1753_v49  ;;  %v1763_v52 = vld [vmem:[#allocation2 + $0x1a8] sm:$0xff]  ;;  %v1771_v55 = vld [vmem:[#allocation2 + $0x160] sm:$0xff]  ;;  %v1781_v58 = vld [vmem:[#allocation2 + $0x118] sm:$0xff] }
  0x1a   :  { %629 = vmatpush.bf16.msra.mxu2 %v1680_v19  ;;  %772 = vst [vmem:[#allocation1] ss:$9 sm:$0xff] %v770_v47  ;;  %v1765_v53 = vld [vmem:[#allocation2 + $0x1e8] sm:$0xff]  ;;  %v1775_v56 = vld [vmem:[#allocation2 + $0x1a0] sm:$0xff]  ;;  %v1783_v59 = vld [vmem:[#allocation2 + $0x158] sm:$0xff] }
  0x1b   :  { %642 = vmatpush.bf16.msra.mxu3 %v1682_v20  ;;  %2100 = vst [vmem:[#allocation20_spill] sm:$0xff] %v1763_v52  ;;  %v1777_v57 = vld [vmem:[#allocation2 + $0x1e0] sm:$0xff]  ;;  %v1787_v60 = vld [vmem:[#allocation2 + $0x198] sm:$0xff]  ;;  %v1793_v62 = vld [vmem:[#allocation2 + $0x110] sm:$0xff] }
  0x1c   :  { %604 = vmatpush.bf16.msra.mxu0 %v1684_v21  ;;  %2101 = vst [vmem:[#allocation21_spill] sm:$0xff] %v1765_v53  ;;  %v1789_v61 = vld [vmem:[#allocation2 + $0x1d8] sm:$0xff]  ;;  %v1795_v63 = vld [vmem:[#allocation2 + $0x150] sm:$0xff]  ;;  %v1813_v47 = vld [vmem:[#allocation2 + $0x1c8] sm:$0xff] }
  0x1d   :  { %617 = vmatpush.bf16.msra.mxu1 %v1688_v22  ;;  %2102 = vst [vmem:[#allocation22_spill] sm:$0xff] %v1775_v56  ;;  %v1799_v16 = vld [vmem:[#allocation2 + $0x190] sm:$0xff] }
  0x1e   :  { %630 = vmatpush.bf16.msra.mxu2 %v1692_v23  ;;  %2103 = vst [vmem:[#allocation23_spill] sm:$0xff] %v1777_v57 }
  0x1f   :  { %643 = vmatpush.bf16.msra.mxu3 %v1694_v24  ;;  %2104 = vst [vmem:[#allocation24_spill] sm:$0xff] %v1787_v60 }
  0x20   :  { %605 = vmatpush.bf16.msra.mxu0 %v1698_v25  ;;  %2105 = vst [vmem:[#allocation25_spill] sm:$0xff] %v1789_v61 }
  0x21   :  { %618 = vmatpush.bf16.msra.mxu1 %v1700_v26  ;;  %2106 = vst [vmem:[#allocation26_spill] sm:$0xff] %v1799_v16 }
  0x22   :  { %631 = vmatpush.bf16.msra.mxu2 %v1704_v27  ;;  %2109 = vst [vmem:[#allocation29_spill] sm:$0xff] %v1813_v47 }
  0x23   :  { %644 = vmatpush.bf16.msra.mxu3 %v1706_v28 }
  0x24   :  { %606 = vmatpush.bf16.msra.mxu0 %v1710_v29 }
  0x25   :  { %619 = vmatpush.bf16.msra.mxu1 %v1712_v30 }
  0x26   :  { %632 = vmatpush.bf16.msra.mxu2 %v1716_v31 }
  0x27   :  { %645 = vmatpush.bf16.msra.mxu3 %v1718_v32  ;;  %607 = vmatmul.bf16.vlgmr.msra.gmra.mxu0 %v199_v40  ;;  %v1805_v40 = vld [vmem:[#allocation2 + $0x108] sm:$0xff] }
  0x28   :  { %651 = vmatpush.bf16.msrb.mxu0 %v1720_v33  ;;  %620 = vmatmul.bf16.vlgmr.msra.gmra.mxu1 %v200_v42  ;;  %v1811_v42 = vld [vmem:[#allocation2 + $0x188] sm:$0xff] }
  0x29   :  { %664 = vmatpush.bf16.msrb.mxu1 %v1722_v34  ;;  %633 = vmatmul.bf16.vlgmr.msra.gmra.mxu2 %v201_v39  ;;  %v1801_v39 = vld [vmem:[#allocation2 + $0x1d0] sm:$0xff]  ;;  %2108 = vst [vmem:[#allocation28_spill] sm:$0xff] %v1811_v42 }
  0x2a   :  { %677 = vmatpush.bf16.msrb.mxu2 %v1724_v35  ;;  %646 = vmatmul.bf16.vlgmr.msra.gmra.mxu3 %v202_v41  ;;  %2107 = vst [vmem:[#allocation27_spill] sm:$0xff] %v1801_v39  ;;  %v1807_v41 = vld [vmem:[#allocation2 + $0x148] sm:$0xff] }
  0x2b   :  { %690 = vmatpush.bf16.msrb.mxu3 %v1726_v36 }
  0x2c   :  { %652 = vmatpush.bf16.msrb.mxu0 %v1730_v37 }
  0x2d   :  { %665 = vmatpush.bf16.msrb.mxu1 %v1732_v38 }
  0x2e   :  { %678 = vmatpush.bf16.msrb.mxu2 %v1751_v48 }
  0x2f   :  { %691 = vmatpush.bf16.msrb.mxu3 %v1753_v49  ;;  %v1825_v49 = vld [vmem:[#allocation2 + $0x1c0] sm:$0xff] }
  0x30   :  { %653 = vmatpush.bf16.msrb.mxu0 %v1757_v50  ;;  %2111 = vst [vmem:[#allocation31_spill] sm:$0xff] %v1825_v49 }
  0x31   :  { %666 = vmatpush.bf16.msrb.mxu1 %v1759_v51 }
  0x32   :  { %679 = vmatpush.bf16.msrb.mxu2 %v1763_v52 }
  0x33   :  { %692 = vmatpush.bf16.msrb.mxu3 %v1765_v53  ;;  %v1823_v53 = vld [vmem:[#allocation2 + $0x180] sm:$0xff] }
  0x34   :  { %654 = vmatpush.bf16.msrb.mxu0 %v1769_v54  ;;  %2110 = vst [vmem:[#allocation30_spill] sm:$0xff] %v1823_v53 }
  0x35   :  { %667 = vmatpush.bf16.msrb.mxu1 %v1771_v55 }
  0x36   :  { %680 = vmatpush.bf16.msrb.mxu2 %v1775_v56 }
  0x37   :  { %693 = vmatpush.bf16.msrb.mxu3 %v1777_v57  ;;  %v1819_v57 = vld [vmem:[#allocation2 + $0x140] sm:$0xff] }
  0x38   :  { %655 = vmatpush.bf16.msrb.mxu0 %v1781_v58 }
  0x39   :  { %668 = vmatpush.bf16.msrb.mxu1 %v1783_v59 }
  0x3a   :  { %681 = vmatpush.bf16.msrb.mxu2 %v1787_v60 }
  0x3b   :  { %694 = vmatpush.bf16.msrb.mxu3 %v1789_v61  ;;  %v1817_v61 = vld [vmem:[#allocation2 + $0x100] sm:$0xff] }
  0x3c   :  { %656 = vmatpush.bf16.msrb.mxu0 %v1793_v62 }
  0x3d   :  { %669 = vmatpush.bf16.msrb.mxu1 %v1795_v63 }
  0x3e   :  { %682 = vmatpush.bf16.msrb.mxu2 %v1799_v16 }
  0x3f   :  { %695 = vmatpush.bf16.msrb.mxu3 %v1801_v39  ;;  %v1830_v39 = vld [vmem:[%s2060_s5 + $0x38] sm:$0xff] }
  0x40   :  { %657 = vmatpush.bf16.msrb.mxu0 %v1805_v40 }
  0x41   :  { %670 = vmatpush.bf16.msrb.mxu1 %v1807_v41 }
  0x42   :  { %683 = vmatpush.bf16.msrb.mxu2 %v1811_v42 }
  0x43   :  { %696 = vmatpush.bf16.msrb.mxu3 %v1813_v47  ;;  %v1840_v47 = vld [vmem:[%s2060_s5 + $0x30] sm:$0xff] }
  0x44   :  { %658 = vmatpush.bf16.msrb.mxu0 %v1817_v61 }
  0x45   :  { %671 = vmatpush.bf16.msrb.mxu1 %v1819_v57 }
  0x46   :  { %684 = vmatpush.bf16.msrb.mxu2 %v1823_v53 }
  0x47   :  { %697 = vmatpush.bf16.msrb.mxu3 %v1825_v49  ;;  %659 = vmatmul.bf16.vlgmr.msrb.gmra.mxu0 %v1736_v43  ;;  %v1853_v49 = vld [vmem:[%s2060_s5 + $0x28] sm:$0xff]  ;;  %v1862_v43 = vld [vmem:[%s2060_s5 + $0x20] sm:$0xff] }
  0x48   :  { %756 = vmatpush.bf16.msra.mxu0 %v1830_v39  ;;  %672 = vmatmul.bf16.vlgmr.msrb.gmra.mxu1 %v1738_v44  ;;  %v1871_v44 = vld [vmem:[%s2060_s5 + $0x18] sm:$0xff] }
  0x49   :  { %685 = vmatmul.bf16.vlgmr.msrb.gmra.mxu2 %v1742_v45  ;;  %789 = vmatpush.bf16.msra.mxu1 %v1625_v0  ;;  %v1916_v45 = vld [vmem:[%s2060_s5 + $0x10] sm:$0xff] }
  0x4a   :  { %802 = vmatpush.bf16.msra.mxu2 %v1627_v1  ;;  %698 = vmatmul.bf16.vlgmr.msrb.gmra.mxu3 %v1744_v46  ;;  %v1922_v46 = vld [vmem:[%s2060_s5 + $0x8] sm:$0xff] }
  0x4b   :  { %815 = vmatpush.bf16.msra.mxu3 %v1629_v2 }
  0x4c   :  { %757 = vmatpush.bf16.msra.mxu0 %v1840_v47 }
  0x4d   :  { %790 = vmatpush.bf16.msra.mxu1 %v1635_v4 }
  0x4e   :  { %803 = vmatpush.bf16.msra.mxu2 %v1637_v5 }
  0x4f   :  { %816 = vmatpush.bf16.msra.mxu3 %v1641_v6 }
  0x50   :  { %758 = vmatpush.bf16.msra.mxu0 %v1853_v49 }
  0x51   :  { %791 = vmatpush.bf16.msra.mxu1 %v1647_v8 }
  0x52   :  { %804 = vmatpush.bf16.msra.mxu2 %v1649_v9 }
  0x53   :  { %817 = vmatpush.bf16.msra.mxu3 %v1653_v10 }
  0x54   :  { %759 = vmatpush.bf16.msra.mxu0 %v1862_v43 }
  0x55   :  { %792 = vmatpush.bf16.msra.mxu1 %v1659_v12 }
  0x56   :  { %805 = vmatpush.bf16.msra.mxu2 %v1661_v13 }
  0x57   :  { %818 = vmatpush.bf16.msra.mxu3 %v1665_v14 }
  0x58   :  { %760 = vmatpush.bf16.msra.mxu0 %v1871_v44 }
  0x59   :  { %793 = vmatpush.bf16.msra.mxu1 %v1674_v17 }
  0x5a   :  { %806 = vmatpush.bf16.msra.mxu2 %v1676_v18 }
  0x5b   :  { %819 = vmatpush.bf16.msra.mxu3 %v1680_v19  ;;  %v773_v19 = vld [vmem:[#allocation1] sm:$0xff] }
  0x5c   :  { %761 = vmatpush.bf16.msra.mxu0 %v1916_v45 }
  0x5d   :  { %794 = vmatpush.bf16.msra.mxu1 %v1684_v21 }
  0x5e   :  { %807 = vmatpush.bf16.msra.mxu2 %v1688_v22 }
  0x5f   :  { %820 = vmatpush.bf16.msra.mxu3 %v1692_v23 }
  0x60   :  { %762 = vmatpush.bf16.msra.mxu0 %v1922_v46 }
  0x61   :  { %795 = vmatpush.bf16.msra.mxu1 %v1698_v25 }
  0x62   :  { %808 = vmatpush.bf16.msra.mxu2 %v1700_v26 }
  0x63   :  { %821 = vmatpush.bf16.msra.mxu3 %v1704_v27  ;;  %v1943_v27 = vld [vmem:[%s2059_s4] ss:$0 sm:$0xff] }
  0x65   :  { %796 = vmatpush.bf16.msra.mxu1 %v1710_v29 }
  0x66   :  { %809 = vmatpush.bf16.msra.mxu2 %v1712_v30 }
  0x67   :  { %822 = vmatpush.bf16.msra.mxu3 %v1716_v31  ;;  %v775_v31 = vld [vmem:[#allocation1 + $0x12] sm:$0xff] }
  0x68   :  { %797 = vmatmul.bf16.vlgmr.msra.gmra.mxu1 %v773_v19 }
  0x69   :  { %841 = vmatpush.bf16.msrb.mxu1 %v1720_v33 }
  0x6a   :  { %854 = vmatpush.bf16.msrb.mxu2 %v1722_v34  ;;  %823 = vmatmul.bf16.vlgmr.msra.gmra.mxu3 %v775_v31 }
  0x6b   :  { %867 = vmatpush.bf16.msrb.mxu3 %v1724_v35  ;;  %v774_v35 = vld [vmem:[#allocation1 + $0x9] sm:$0xff] }
  0x6c   :  { %810 = vmatmul.bf16.vlgmr.msra.gmra.mxu2 %v774_v35 }
  0x6d   :  { %842 = vmatpush.bf16.msrb.mxu1 %v1730_v37 }
  0x6e   :  { %855 = vmatpush.bf16.msrb.mxu2 %v1732_v38 }
  0x6f   :  { %868 = vmatpush.bf16.msrb.mxu3 %v1751_v48 }
  0x71   :  { %843 = vmatpush.bf16.msrb.mxu1 %v1757_v50 }
  0x72   :  { %856 = vmatpush.bf16.msrb.mxu2 %v1759_v51 }
  0x73   :  { %869 = vmatpush.bf16.msrb.mxu3 %v1763_v52 }
  0x75   :  { %844 = vmatpush.bf16.msrb.mxu1 %v1769_v54 }
  0x76   :  { %857 = vmatpush.bf16.msrb.mxu2 %v1771_v55 }
  0x77   :  { %870 = vmatpush.bf16.msrb.mxu3 %v1775_v56 }
  0x79   :  { %845 = vmatpush.bf16.msrb.mxu1 %v1781_v58 }
  0x7a   :  { %858 = vmatpush.bf16.msrb.mxu2 %v1783_v59 }
  0x7b   :  { %871 = vmatpush.bf16.msrb.mxu3 %v1787_v60 }
  0x7d   :  { %846 = vmatpush.bf16.msrb.mxu1 %v1793_v62 }
  0x7e   :  { %859 = vmatpush.bf16.msrb.mxu2 %v1795_v63 }
  0x7f   :  { %872 = vmatpush.bf16.msrb.mxu3 %v1799_v16 }
  0x81   :  { %847 = vmatpush.bf16.msrb.mxu1 %v1805_v40 }
  0x82   :  { %860 = vmatpush.bf16.msrb.mxu2 %v1807_v41 }
  0x83   :  { %873 = vmatpush.bf16.msrb.mxu3 %v1811_v42 }
  0x85   :  { %848 = vmatpush.bf16.msrb.mxu1 %v1817_v61 }
  0x86   :  { %861 = vmatpush.bf16.msrb.mxu2 %v1819_v57 }
  0x87   :  { %874 = vmatpush.bf16.msrb.mxu3 %v1823_v53  ;;  %v1928_v53 = vld [vmem:[%s2060_s5] sm:$0xff] }
  0x88   :  { %763 = vmatpush.bf16.msra.mxu0 %v1928_v53 }
  0x89   :  { %895 = vmatpush.bf16.msra.mxu1 %v1830_v39 }
  0x8a   :  { %928 = vmatpush.bf16.msra.mxu2 %v1625_v0 }
  0x8b   :  { %941 = vmatpush.bf16.msra.mxu3 %v1627_v1 }
  0x8c   :  { %828 = vmatpush.bf16.msrb.mxu0 %v1631_v3 }
  0x8d   :  { %896 = vmatpush.bf16.msra.mxu1 %v1840_v47 }
  0x8e   :  { %929 = vmatpush.bf16.msra.mxu2 %v1635_v4  ;;  %v779_v4 = vld [vmem:[#allocation1 + $0x36] sm:$0xff] }
  0x8f   :  { %942 = vmatpush.bf16.msra.mxu3 %v1637_v5 }
  0x90   :  { %829 = vmatpush.bf16.msrb.mxu0 %v1643_v7  ;;  %875 = vmatmul.bf16.vlgmr.msrb.gmra.mxu3 %v779_v4 }
  0x91   :  { %897 = vmatpush.bf16.msra.mxu1 %v1853_v49 }
  0x92   :  { %930 = vmatpush.bf16.msra.mxu2 %v1647_v8 }
  0x93   :  { %943 = vmatpush.bf16.msra.mxu3 %v1649_v9 }
  0x94   :  { %830 = vmatpush.bf16.msrb.mxu0 %v1655_v11 }
  0x95   :  { %898 = vmatpush.bf16.msra.mxu1 %v1862_v43 }
  0x96   :  { %931 = vmatpush.bf16.msra.mxu2 %v1659_v12 }
  0x97   :  { %944 = vmatpush.bf16.msra.mxu3 %v1661_v13 }
  0x98   :  { %831 = vmatpush.bf16.msrb.mxu0 %v1667_v15 }
  0x99   :  { %899 = vmatpush.bf16.msra.mxu1 %v1871_v44 }
  0x9a   :  { %932 = vmatpush.bf16.msra.mxu2 %v1674_v17 }
  0x9b   :  { %945 = vmatpush.bf16.msra.mxu3 %v1676_v18 }
  0x9c   :  { %832 = vmatpush.bf16.msrb.mxu0 %v1682_v20 }
  0x9d   :  { %900 = vmatpush.bf16.msra.mxu1 %v1916_v45 }
  0x9e   :  { %933 = vmatpush.bf16.msra.mxu2 %v1684_v21 }
  0x9f   :  { %946 = vmatpush.bf16.msra.mxu3 %v1688_v22 }
  0xa0   :  { %833 = vmatpush.bf16.msrb.mxu0 %v1694_v24 }
  0xa1   :  { %901 = vmatpush.bf16.msra.mxu1 %v1922_v46 }
  0xa2   :  { %934 = vmatpush.bf16.msra.mxu2 %v1698_v25 }
  0xa3   :  { %947 = vmatpush.bf16.msra.mxu3 %v1700_v26  ;;  %v2112_v26 = vld [vmem:[#allocation19_spill] sm:$0xff] }
  0xa4   :  { %v608_v42 = vpop.f32.mrf.mxu0  ;;  %834 = vmatpush.bf16.msrb.mxu0 %v1706_v28 }
  0xa5   :  { %v621_v16 = vpop.f32.mrf.mxu1  ;;  %v609_v35 = vadd.f32 %v1943_v27, %v608_v42  ;;  %902 = vmatpush.bf16.msra.mxu1 %v1928_v53  ;;  %v909_v42 = vld [vmem:[%s2057_s2] sm:$0xff] }
  0xa6   :  { %935 = vmatpush.bf16.msra.mxu2 %v1710_v29  ;;  %v2113_v29 = vld [vmem:[#allocation21_spill] sm:$0xff] }
  0xa7   :  { %v622_v0 = vadd.f32 %v621_v16, %v609_v35  ;;  %948 = vmatpush.bf16.msra.mxu3 %v1712_v30  ;;  %v776_v30 = vld [vmem:[#allocation1 + $0x1b] sm:$0xff] }
  0xa8   :  { %835 = vmatpush.bf16.msrb.mxu0 %v1718_v32 }
  0xab   :  { %993 = vmatpush.bf16.msrb.mxu3 %v1722_v34  ;;  %v2121_v34 = vld [vmem:[#allocation14_spill] sm:$0xff] }
  0xac   :  { %v634_v60 = vpop.f32.mrf.mxu2  ;;  %v610_v52 = vpop.f32.mrf.mxu0 }
  0xad   :  { %v647_v56 = vpop.f32.mrf.mxu3  ;;  %v623_v48 = vpop.f32.mrf.mxu1  ;;  %v635_v1 = vadd.f32 %v634_v60, %v622_v0  ;;  %v2023_v0 = vld [vmem:[%s2061_s6] ss:$0 sm:$0xff] }
  0xaf   :  { %v648_v5 = vadd.f32 %v647_v56, %v635_v1  ;;  %994 = vmatpush.bf16.msrb.mxu3 %v1732_v38  ;;  %v2123_v38 = vld [vmem:[#allocation16_spill] sm:$0xff] }
  0xb3   :  { %995 = vmatpush.bf16.msrb.mxu3 %v1759_v51  ;;  %v2127_v51 = vld [vmem:[#allocation22_spill] sm:$0xff] }
  0xb4   :  { %v636_v23 = vpop.f32.mrf.mxu2 }
  0xb5   :  { %v649_v14 = vpop.f32.mrf.mxu3  ;;  %v777_v23 = vld [vmem:[#allocation1 + $0x24] sm:$0xff] }
  0xb6   :  { %v778_v14 = vld [vmem:[#allocation1 + $0x2d] sm:$0xff]  ;;  %849 = vmatmul.bf16.vlgmr.msrb.gmra.mxu1 %v777_v23 }
  0xb7   :  { %862 = vmatmul.bf16.vlgmr.msrb.gmra.mxu2 %v778_v14  ;;  %967 = vmatpush.bf16.msrb.mxu1 %v1631_v3  ;;  %v2114_v3 = vld [vmem:[#allocation23_spill] sm:$0xff] }
  0xb8   :  { %980 = vmatpush.bf16.msrb.mxu2 %v1720_v33  ;;  %996 = vmatpush.bf16.msrb.mxu3 %v1771_v55  ;;  %v780_v33 = vld [vmem:[#allocation1 + $0x3f] sm:$0xff] }
  0xb9   :  { %v2131_v55 = vld [vmem:[#allocation30_spill] sm:$0xff]  ;;  %911 = vst [vmem:[#allocation1] ss:$9 sm:$0xff] %v909_v42 }
  0xbb   :  { %968 = vmatpush.bf16.msrb.mxu1 %v1643_v7  ;;  %v2115_v7 = vld [vmem:[#allocation25_spill] sm:$0xff] }
  0xbc   :  { %981 = vmatpush.bf16.msrb.mxu2 %v1730_v37  ;;  %997 = vmatpush.bf16.msrb.mxu3 %v1783_v59  ;;  %v2122_v37 = vld [vmem:[#allocation15_spill] sm:$0xff] }
  0xbf   :  { %969 = vmatpush.bf16.msrb.mxu1 %v1655_v11  ;;  %v2116_v11 = vld [vmem:[#allocation27_spill] sm:$0xff] }
  0xc0   :  { %982 = vmatpush.bf16.msrb.mxu2 %v1757_v50  ;;  %998 = vmatpush.bf16.msrb.mxu3 %v1795_v63  ;;  %v2125_v50 = vld [vmem:[#allocation18_spill] sm:$0xff] }
  0xc3   :  { %970 = vmatpush.bf16.msrb.mxu1 %v1667_v15  ;;  %v2117_v15 = vld [vmem:[#allocation29_spill] sm:$0xff] }
  0xc4   :  { %v660_v19 = vpop.f32.mrf.mxu0  ;;  %983 = vmatpush.bf16.msrb.mxu2 %v1769_v54  ;;  %999 = vmatpush.bf16.msrb.mxu3 %v1807_v41  ;;  %v2130_v54 = vld [vmem:[#allocation28_spill] sm:$0xff] }
  0xc5   :  { %v673_v8 = vpop.f32.mrf.mxu1  ;;  %v661_v9 = vadd.f32 %v660_v19, %v648_v5  ;;  %v912_v5 = vld [vmem:[#allocation1] sm:$0xff]  ;;  %v913_v19 = vld [vmem:[#allocation1 + $0x9] sm:$0xff] }
  0xc6   :  { %949 = vmatmul.bf16.vlgmr.msra.gmra.mxu3 %v913_v19 }
  0xc7   :  { %v674_v12 = vadd.f32 %v673_v8, %v661_v9  ;;  %971 = vmatpush.bf16.msrb.mxu1 %v1682_v20  ;;  %v2118_v20 = vld [vmem:[#allocation31_spill] sm:$0xff]  ;;  %936 = vmatmul.bf16.vlgmr.msra.gmra.mxu2 %v912_v5 }
  0xc8   :  { %984 = vmatpush.bf16.msrb.mxu2 %v1781_v58  ;;  %1000 = vmatpush.bf16.msrb.mxu3 %v1819_v57 }
  0xcb   :  { %972 = vmatpush.bf16.msrb.mxu1 %v1694_v24  ;;  %v2119_v24 = vld [vmem:[#allocation12_spill] sm:$0xff] }
  0xcc   :  { %v686_v13 = vpop.f32.mrf.mxu2  ;;  %v662_v48 = vpop.f32.mrf.mxu0  ;;  %985 = vmatpush.bf16.msrb.mxu2 %v1793_v62 }
  0xcd   :  { %v699_v31 = vpop.f32.mrf.mxu3  ;;  %v687_v17 = vadd.f32 %v686_v13, %v674_v12  ;;  %v675_v52 = vpop.f32.mrf.mxu1  ;;  %v914_v12 = vld [vmem:[#allocation1 + $0x12] sm:$0xff] }
  0xce   :  { %v917_v52 = vld [vmem:[#allocation1 + $0x2d] sm:$0xff] }
  0xcf   :  { %v700_v18 = vadd.f32 %v699_v31, %v687_v17  ;;  %973 = vmatpush.bf16.msrb.mxu1 %v1706_v28  ;;  %v2120_v28 = vld [vmem:[#allocation13_spill] sm:$0xff]  ;;  %v916_v17 = vld [vmem:[#allocation1 + $0x24] sm:$0xff] }
  0xd0   :  { %986 = vmatpush.bf16.msrb.mxu2 %v1805_v40 }
  0xd1   :  { %v703_v21 = vmax.f32 %v700_v18, 0.0 }
  0xd3   :  { %v704_v22 = vpack.c.bf16 %v703_v21, %v703_v21  ;;  %974 = vmatpush.bf16.msrb.mxu1 %v1718_v32  ;;  %v2124_v32 = vld [vmem:[#allocation17_spill] sm:$0xff] }
  0xd4   :  { %v688_v56 = vpop.f32.mrf.mxu2  ;;  %987 = vmatpush.bf16.msrb.mxu2 %v1817_v61  ;;  %v918_v21 = vld [vmem:[#allocation1 + $0x36] sm:$0xff] }
  0xd5   :  { %v701_v25 = vpop.f32.mrf.mxu3  ;;  %764 = vmatmul.bf16.vlgmr.msra.gmra.mxu0 %v704_v22 }
  0xd6   :  { %880 = vmatpush.bf16.msra.mxu0 %v1726_v36  ;;  %1001 = vmatmul.bf16.vlgmr.msrb.gmra.mxu3 %v917_v52 }
  0xd7   :  { %988 = vmatmul.bf16.vlgmr.msrb.gmra.mxu2 %v916_v17 }
  0xd8   :  { %1034 = vmatpush.bf16.msra.mxu2 %v1830_v39 }
  0xda   :  { %881 = vmatpush.bf16.msra.mxu0 %v2112_v26 }
  0xdc   :  { %1035 = vmatpush.bf16.msra.mxu2 %v1840_v47 }
  0xde   :  { %882 = vmatpush.bf16.msra.mxu0 %v2113_v29 }
  0xe0   :  { %1036 = vmatpush.bf16.msra.mxu2 %v1853_v49 }
  0xe2   :  { %883 = vmatpush.bf16.msra.mxu0 %v2114_v3 }
  0xe4   :  { %1037 = vmatpush.bf16.msra.mxu2 %v1862_v43 }
  0xe5   :  { %836 = vmatmul.bf16.vlgmr.msrb.gmra.mxu0 %v776_v30  ;;  %v798_v57 = vpop.f32.mrf.mxu1 }
  0xe6   :  { %884 = vmatpush.bf16.msra.mxu0 %v2115_v7  ;;  %v799_v8 = vadd.f32 %v1943_v27, %v798_v57 }
  0xe8   :  { %1038 = vmatpush.bf16.msra.mxu2 %v1871_v44  ;;  %v915_v44 = vld [vmem:[#allocation1 + $0x1b] sm:$0xff] }
  0xea   :  { %885 = vmatpush.bf16.msra.mxu0 %v2116_v11 }
  0xec   :  { %1039 = vmatpush.bf16.msra.mxu2 %v1916_v45 }
  0xed   :  { %v824_v59 = vpop.f32.mrf.mxu3  ;;  %v800_v60 = vpop.f32.mrf.mxu1 }
  0xee   :  { %886 = vmatpush.bf16.msra.mxu0 %v2117_v15 }
  0xef   :  { %v811_v58 = vpop.f32.mrf.mxu2 }
  0xf0   :  { %v812_v9 = vadd.f32 %v811_v58, %v799_v8  ;;  %1040 = vmatpush.bf16.msra.mxu2 %v1922_v46 }
  0xf2   :  { %887 = vmatpush.bf16.msra.mxu0 %v2118_v20  ;;  %v825_v13 = vadd.f32 %v824_v59, %v812_v9 }
  0xf4   :  { %1041 = vmatpush.bf16.msra.mxu2 %v1928_v53  ;;  %v919_v53 = vld [vmem:[#allocation1 + $0x3f] sm:$0xff] }
  0xf5   :  { %888 = vmatmul.bf16.vlgmr.msra.gmra.mxu0 %v780_v33  ;;  %v826_v62 = vpop.f32.mrf.mxu3 }
  0xf6   :  { %954 = vmatpush.bf16.msrb.mxu0 %v1629_v2  ;;  %v2126_v2 = vld [vmem:[#allocation20_spill] sm:$0xff] }
  0xf7   :  { %v813_v61 = vpop.f32.mrf.mxu2 }
  0xfa   :  { %955 = vmatpush.bf16.msrb.mxu0 %v1641_v6  ;;  %v2128_v6 = vld [vmem:[#allocation24_spill] sm:$0xff] }
  0xfe   :  { %956 = vmatpush.bf16.msrb.mxu0 %v1653_v10  ;;  %v2129_v10 = vld [vmem:[#allocation26_spill] sm:$0xff] }
 0x102   :  { %957 = vmatpush.bf16.msrb.mxu0 %v2119_v24 }
 0x106   :  { %958 = vmatpush.bf16.msrb.mxu0 %v2120_v28 }
 0x10a   :  { %959 = vmatpush.bf16.msrb.mxu0 %v2121_v34 }
 0x10e   :  { %960 = vmatpush.bf16.msrb.mxu0 %v2122_v37 }
 0x112   :  { %961 = vmatpush.bf16.msrb.mxu0 %v2123_v38 }
 0x113   :  { %v876_v40 = vpop.f32.mrf.mxu3 }
 0x115   :  { %962 = vmatmul.bf16.vlgmr.msrb.gmra.mxu0 %v914_v12 }
 0x116   :  { %1006 = vmatpush.bf16.msra.mxu0 %v2124_v32 }
 0x11a   :  { %1007 = vmatpush.bf16.msra.mxu0 %v2125_v50 }
 0x11b   :  { %v878_v1 = vpop.f32.mrf.mxu3 }
 0x11e   :  { %1008 = vmatpush.bf16.msra.mxu0 %v2126_v2 }
 0x122   :  { %1009 = vmatpush.bf16.msra.mxu0 %v2127_v51 }
 0x126   :  { %1010 = vmatpush.bf16.msra.mxu0 %v2128_v6 }
 0x12a   :  { %1011 = vmatpush.bf16.msra.mxu0 %v2129_v10 }
 0x12e   :  { %1012 = vmatpush.bf16.msra.mxu0 %v2130_v54 }
 0x132   :  { %1013 = vmatpush.bf16.msra.mxu0 %v2131_v55 }
 0x133   :  { %v850_v63 = vpop.f32.mrf.mxu1 }
 0x135   :  { %1014 = vmatmul.bf16.vlgmr.msra.gmra.mxu0 %v918_v21 }
 0x13a   :  { %v863_v16 = vpop.f32.mrf.mxu2 }
 0x13b   :  { %v852_v41 = vpop.f32.mrf.mxu1 }
 0x142   :  { %v865_v35 = vpop.f32.mrf.mxu2 }
 0x14a   :  { %v937_v45 = vpop.f32.mrf.mxu2 }
 0x152   :  { %v765_v14 = vpop.f32.mrf.mxu0 }
 0x153   :  { %v766_v4 = vadd.f32 %v2023_v0, %v765_v14 }
 0x155   :  { %769 = vst [vmem:[#allocation5] sm:$0x3] %v766_v4 }
 0x156   :  { %1058 = dma.vmem_to_hbm [thread:$0]  %s1054_s1, 32, %s1056_s20, [#allocation4]  }
 0x15a   :  { %v767_v23 = vpop.f32.mrf.mxu0 }
 0x162   :  { %v837_v31 = vpop.f32.mrf.mxu0 }
 0x163   :  { %v838_v48 = vadd.f32 %v837_v31, %v825_v13 }
 0x165   :  { %v851_v39 = vadd.f32 %v850_v63, %v838_v48 }
 0x167   :  { %v864_v47 = vadd.f32 %v863_v16, %v851_v39 }
 0x169   :  { %v877_v49 = vadd.f32 %v876_v40, %v864_v47 }
 0x16a   :  { %v839_v18 = vpop.f32.mrf.mxu0 }
 0x172   :  { %v889_v22 = vpop.f32.mrf.mxu0 }
 0x173   :  { %v890_v43 = vadd.f32 %v889_v22, %v877_v49 }
 0x175   :  { %v893_v56 = vmax.f32 %v890_v43, 0.0 }
 0x177   :  { %v894_v25 = vpack.c.bf16 %v893_v56, %v893_v56 }
 0x179   :  { %903 = vmatmul.bf16.vlgmr.msra.gmra.mxu1 %v894_v25 }
 0x17a   :  { %v891_v30 = vpop.f32.mrf.mxu0  ;;  %1019 = vmatpush.bf16.msra.mxu1 %v1726_v36  ;;  %v950_v36 = vpop.f32.mrf.mxu3 }
 0x17e   :  { %1020 = vmatpush.bf16.msra.mxu1 %v2112_v26  ;;  %v939_v26 = vpop.f32.mrf.mxu2 }
 0x182   :  { %1021 = vmatpush.bf16.msra.mxu1 %v2113_v29  ;;  %v952_v33 = vpop.f32.mrf.mxu3 }
 0x186   :  { %1022 = vmatpush.bf16.msra.mxu1 %v2114_v3  ;;  %v989_v24 = vpop.f32.mrf.mxu2 }
 0x189   :  { %975 = vmatmul.bf16.vlgmr.msrb.gmra.mxu1 %v915_v44 }
 0x18a   :  { %1023 = vmatpush.bf16.msra.mxu1 %v2115_v7  ;;  %v1002_v3 = vpop.f32.mrf.mxu3 }
 0x18e   :  { %1024 = vmatpush.bf16.msra.mxu1 %v2116_v11  ;;  %v991_v34 = vpop.f32.mrf.mxu2 }
 0x192   :  { %1025 = vmatpush.bf16.msra.mxu1 %v2117_v15  ;;  %v963_v46 = vpop.f32.mrf.mxu0  ;;  %v1004_v37 = vpop.f32.mrf.mxu3  ;;  %v938_v15 = vadd.f32 %v1943_v27, %v937_v45 }
 0x194   :  { %v951_v32 = vadd.f32 %v950_v36, %v938_v15 }
 0x196   :  { %1026 = vmatpush.bf16.msra.mxu1 %v2118_v20  ;;  %v964_v50 = vadd.f32 %v963_v46, %v951_v32 }
 0x199   :  { %1027 = vmatmul.bf16.vlgmr.msra.gmra.mxu1 %v919_v53 }
 0x19a   :  { %v965_v29 = vpop.f32.mrf.mxu0 }
 0x1b2   :  { %v1015_v28 = vpop.f32.mrf.mxu0 }
 0x1ba   :  { %v1017_v7 = vpop.f32.mrf.mxu0 }
 0x1f6   :  { %v904_v38 = vpop.f32.mrf.mxu1 }
 0x1f7   :  { %v905_v11 = vadd.f32 %v2023_v0, %v904_v38 }
 0x1f9   :  { %908 = vst [vmem:[#allocation6] sm:$0x3] %v905_v11 }
 0x1fa   :  { %1069 = dma.vmem_to_hbm [thread:$0]  %s1065_s0, 32, %s1067_s3, [#allocation7]  }
 0x1fe   :  { %v906_v20 = vpop.f32.mrf.mxu1 }
 0x206   :  { %v976_v2 = vpop.f32.mrf.mxu1 }
 0x207   :  { %v977_v51 = vadd.f32 %v976_v2, %v964_v50 }
 0x209   :  { %v990_v6 = vadd.f32 %v989_v24, %v977_v51 }
 0x20b   :  { %v1003_v54 = vadd.f32 %v1002_v3, %v990_v6 }
 0x20d   :  { %v1016_v55 = vadd.f32 %v1015_v28, %v1003_v54 }
 0x20e   :  { %v978_v10 = vpop.f32.mrf.mxu1 }
 0x216   :  { %v1028_v57 = vpop.f32.mrf.mxu1 }
 0x217   :  { %v1029_v58 = vadd.f32 %v1028_v57, %v1016_v55 }
 0x219   :  { %v1032_v59 = vmax.f32 %v1029_v58, 0.0 }
 0x21b   :  { %v1033_v60 = vpack.c.bf16 %v1032_v59, %v1032_v59 }
 0x21d   :  { %1042 = vmatmul.bf16.vlgmr.msra.gmra.mxu2 %v1033_v60 }
 0x21e   :  { %v1030_v61 = vpop.f32.mrf.mxu1 }
 0x2a0   :  { %v1043_v27 = vpop.f32.mrf.mxu2 }
 0x2a1   :  { %v1044_v62 = vadd.f32 %v2023_v0, %v1043_v27 }
 0x2a3   :  { %1047 = vst [vmem:[#allocation8] sm:$0x3] %v1044_v62 }
 0x2a4   :  { %1080 = dma.vmem_to_hbm [thread:$0]  %s1076_s22, 32, %s1078_s8, [#allocation7]  }
 0x2a8   :  { %v1045_v63 = vpop.f32.mrf.mxu2 }
 0x2a9   :  { %1562 = dma.done.wait [#allocation4], 32  }
 0x2aa   :  { %1563 = vsyncadd [#allocation4], 4294967264 }
 0x2ab   :  { %1564 = dma.done.wait [#allocation7], 64  }
 0x2ac   :  { %1565 = vsyncadd [#allocation7], 4294967232 }
 0x2ad   :  { %1093 = vsyncpa [#allocation3], 1 }
 0x2ae   :  { %1094 = vsyncpa [#allocation4], 1 }
 0x2af   :  { %1095 = vsyncpa [#allocation7], 1 }

</bundles_post_ra>
